<compile_context>
chip_gen: v7x
topology: tpu7x:2x2x1
jax: 0.10.0
libtpu: 0.0.40
codegen_flags: <defaults>
</compile_context>

<pallas_src>
import jax
import jax.numpy as jnp
from jax.experimental import pallas as pl
from jax.experimental.pallas import tpu as pltpu


def critic_kernel(state_ref, action_ref,
                  w1s_ref, w1a_ref, b1_ref,
                  w2_ref, b2_ref,
                  w3t_ref, b3_ref,
                  out_ref):
    # fc1 on the "virtual concat": two MXU pushes into one fp32 accumulator,
    # so concat([state, action]) is never materialized in HBM.
    h1 = jnp.dot(state_ref[...], w1s_ref[...], preferred_element_type=jnp.float32)
    h1 = h1 + jnp.dot(action_ref[...], w1a_ref[...], preferred_element_type=jnp.float32)
    h1 = jnp.maximum(h1 + b1_ref[...], 0.0).astype(w2_ref.dtype)     # [TB, fc1]

    # fc2 + ReLU (fp32 accumulation; kept fp32 for the tiny head matmul).
    h2 = jnp.dot(h1, w2_ref[...], preferred_element_type=jnp.float32) + b2_ref[...]
    h2 = jnp.maximum(h2, 0.0)                                        # [TB, fc2] fp32

    # q head, lane-dense: q_row[0, t] = sum_f w3[f] * h2[t, f] + b3.
    # Same contraction as q @ k.T in attention; the result is already laid out
    # along lanes so the store below is a full, unmasked vst.
    q_row = jnp.dot(w3t_ref[...].astype(jnp.float32), h2.T,
                    preferred_element_type=jnp.float32) + b3_ref[...]
    out_ref[...] = q_row.astype(out_ref.dtype)                       # [1, TB]


def prepare_params(params, state_size, *, dtype=jnp.float32):
    """One-time (init-time) conversion of PyTorch-layout params into kernel form.

    * w1 is split along its input dim into state / action halves.
    * w3 ([fc2, 1]) is stored transposed as [1, fc2] for the lane-dense q head.
    * Weights are cast to `dtype` (fp32 or bf16); biases stay fp32 because they
      are added to fp32 MXU accumulators.
    Call once at init and reuse the result for every forward — this keeps the
    per-call path free of weight-prep XLA ops.
    """
    w1, b1, w2, b2, w3, b3 = params
    w1_s = w1[:state_size, :].astype(dtype)
    w1_a = w1[state_size:, :].astype(dtype)
    w3_t = w3.reshape(1, -1).astype(dtype)
    return (w1_s, w1_a, b1.astype(jnp.float32),
            w2.astype(dtype), b2.astype(jnp.float32),
            w3_t, b3.reshape(1, 1).astype(jnp.float32))


def critic_forward(state, action, kernel_params, *, block_b=512, core_parallel=False):
    """Pallas-fused TD3 critic forward. state: [B,S], action: [B,A] -> q: [B,1].

    kernel_params: output of prepare_params() (weight prep hoisted out of the
    per-call path).

    block_b: batch tile, must be a multiple of 128; 512-1024 is the sweet spot
    for realistic RL batches on v5e/v6e/v7x (clamped to B for small batches).

    core_parallel: set True on v7x (with >= 2, ideally an even number of tiles)
    to shard the batch axis explicitly across the chip's two TensorCores.
    """
    w1_s, w1_a, b1, w2, b2, w3_t, b3 = kernel_params
    B, S = state.shape
    A = action.shape[1]

    # Cast streaming inputs to the weights' dtype (no-op in fp32 mode; in bf16
    # mode this halves input HBM traffic — ideally the producer already hands
    # us bf16 so even this cast disappears).
    if state.dtype != w1_s.dtype:
        state = state.astype(w1_s.dtype)
    if action.dtype != w1_a.dtype:
        action = action.astype(w1_a.dtype)

    if B <= block_b:
        block_b = B                      # single tile: block == full array dims
    n_tiles = pl.cdiv(B, block_b)        # ragged tail handled by boundary blocks

    # Streaming (batch-tiled) operands.
    # TODO(synk): if the producer owns a contiguous [B, S+A] layout, stream it
    # as one input with one fc1 matmul — only worth it if it avoids a concat.
    def stream(feat):
        return pl.BlockSpec((block_b, feat), lambda i: (i, 0))

    # Grid-invariant operands: constant block index -> stay VMEM-resident.
    def resident(arr):
        return pl.BlockSpec(arr.shape, lambda i: (0, 0))

    out = pl.pallas_call(
        critic_kernel,
        out_shape=jax.ShapeDtypeStruct((1, n_tiles * block_b), jnp.float32),
        grid=(n_tiles,),
        in_specs=[
            stream(S), stream(A),
            resident(w1_s), resident(w1_a), resident(b1),
            resident(w2), resident(b2),
            resident(w3_t), resident(b3),
        ],
        # Lane-dense output: each grid step writes one (1, block_b) slab.
        out_specs=pl.BlockSpec((1, block_b), lambda i: (0, i)),
        compiler_params=pltpu.CompilerParams(
            dimension_semantics=(
                pltpu.CORE_PARALLEL if core_parallel else "parallel",),
        ),
    )(state, action, w1_s, w1_a, b1, w2, b2, w3_t, b3)

    # Columns >= B (ragged tail tile) are padding garbage; drop them here.
    return out[0, :B].reshape(B, 1)


def init_params(key, state_size, action_size, fc1_dims, fc2_dims):
    """PyTorch-style uniform(-1/sqrt(fan_in), 1/sqrt(fan_in)) init.

    Weights are stored pre-transposed as [in, out] so the kernel does x @ W.
    Biases are stored as [1, out] for clean 2-D broadcasting on TPU.
    """
    def linear(key, fan_in, fan_out):
        kw, kb = jax.random.split(key)
        bound = 1.0 / jnp.sqrt(float(fan_in))
        w = jax.random.uniform(kw, (fan_in, fan_out), jnp.float32, -bound, bound)
        b = jax.random.uniform(kb, (1, fan_out), jnp.float32, -bound, bound)
        return w, b

    k1, k2, k3 = jax.random.split(key, 3)
    w1, b1 = linear(k1, state_size + action_size, fc1_dims)
    w2, b2 = linear(k2, fc1_dims, fc2_dims)
    w3, b3 = linear(k3, fc2_dims, 1)
    return (w1, b1, w2, b2, w3, b3)


def reference_forward(state, action, params):
    """Pure-JAX reference of the PyTorch forward (sanity check)."""
    w1, b1, w2, b2, w3, b3 = params
    x = jnp.concatenate([state, action], axis=1)
    h1 = jnp.maximum(x @ w1 + b1, 0.0)
    h2 = jnp.maximum(h1 @ w2 + b2, 0.0)
    return h2 @ w3 + b3


# TODO(synk): the Adam optimizer / .to(device) in __init__ are training-time
# glue, not part of the forward pass, so they are not translated.

if __name__ == "__main__":
    # batch=200 is deliberately NOT a multiple of the tile to exercise the
    # ragged tail path (no per-call jnp.pad anymore).
    batch = 200
    state_size = 16
    action_size = 4
    fc1_dims = 32
    fc2_dims = 32

    key = jax.random.PRNGKey(0)
    kp, ks, ka = jax.random.split(key, 3)

    params = init_params(kp, state_size, action_size, fc1_dims, fc2_dims)
    state = jax.random.normal(ks, (batch, state_size), jnp.float32)
    action = jax.random.normal(ka, (batch, action_size), jnp.float32)

    q_ref = reference_forward(state, action, params)

    # fp32, multi-tile streaming path (2 x 128-row tiles, ragged 200-row batch).
    kparams = prepare_params(params, state_size)
    q = jax.block_until_ready(critic_forward(state, action, kparams, block_b=128))
    assert q.shape == (batch, 1)
    assert jnp.allclose(q, q_ref, atol=1e-4, rtol=1e-4), float(
        jnp.max(jnp.abs(q - q_ref)))

    # fp32, single-tile path (default block_b=512 clamps to the batch).
    q2 = jax.block_until_ready(critic_forward(state, action, kparams))
    assert jnp.allclose(q2, q_ref, atol=1e-4, rtol=1e-4), float(
        jnp.max(jnp.abs(q2 - q_ref)))

    # bf16 streaming inputs / weights, fp32 MXU accumulation (looser tolerance).
    kparams_bf16 = prepare_params(params, state_size, dtype=jnp.bfloat16)
    q3 = jax.block_until_ready(critic_forward(state, action, kparams_bf16, block_b=128))
    assert jnp.allclose(q3, q_ref, atol=5e-2, rtol=5e-2), float(
        jnp.max(jnp.abs(q3 - q_ref)))

    print("KERNEL_OK")
</pallas_src>

<mosaic_0001>
module attributes {stable_mosaic.version = 11 : i64} {
  func.func @critic_kernel(%arg0: i32, %arg1: memref<128x16xf32, #tpu.memory_space<vmem>>, %arg2: memref<128x4xf32, #tpu.memory_space<vmem>>, %arg3: memref<16x32xf32, #tpu.memory_space<vmem>>, %arg4: memref<4x32xf32, #tpu.memory_space<vmem>>, %arg5: memref<1x32xf32, #tpu.memory_space<vmem>>, %arg6: memref<32x32xf32, #tpu.memory_space<vmem>>, %arg7: memref<1x32xf32, #tpu.memory_space<vmem>>, %arg8: memref<1x32xf32, #tpu.memory_space<vmem>>, %arg9: memref<1x1xf32, #tpu.memory_space<vmem>>, %arg10: memref<1x128xf32, #tpu.memory_space<vmem>>) attributes {dimension_semantics = [#tpu.dimension_semantics<parallel>], iteration_bounds = array<i64: 2>, scalar_prefetch = 0 : i64, scratch_operands = 0 : i64, tpu.core_type = #tpu.core_type<tc>, window_params = [{transform_indices = @transform_0, window_bounds = array<i64: 128, 16>}, {transform_indices = @transform_1, window_bounds = array<i64: 128, 4>}, {pipeline_mode = #tpu.pipeline_mode<synchronous>, transform_indices = @transform_2, window_bounds = array<i64: 16, 32>}, {pipeline_mode = #tpu.pipeline_mode<synchronous>, transform_indices = @transform_3, window_bounds = array<i64: 4, 32>}, {pipeline_mode = #tpu.pipeline_mode<synchronous>, transform_indices = @transform_4, window_bounds = array<i64: 1, 32>}, {pipeline_mode = #tpu.pipeline_mode<synchronous>, transform_indices = @transform_5, window_bounds = array<i64: 32, 32>}, {pipeline_mode = #tpu.pipeline_mode<synchronous>, transform_indices = @transform_6, window_bounds = array<i64: 1, 32>}, {pipeline_mode = #tpu.pipeline_mode<synchronous>, transform_indices = @transform_7, window_bounds = array<i64: 1, 32>}, {pipeline_mode = #tpu.pipeline_mode<synchronous>, transform_indices = @transform_8, window_bounds = array<i64: 1, 1>}, {transform_indices = @transform_9, window_bounds = array<i64: 1, 128>}]} {
    %c0 = arith.constant 0 : index
    %c0_0 = arith.constant 0 : index
    %0 = vector.load %arg1[%c0, %c0_0] : memref<128x16xf32, #tpu.memory_space<vmem>>, vector<128x16xf32>
    %c0_1 = arith.constant 0 : index
    %c0_2 = arith.constant 0 : index
    %1 = vector.load %arg3[%c0_1, %c0_2] : memref<16x32xf32, #tpu.memory_space<vmem>>, vector<16x32xf32>
    %cst = arith.constant dense<0.000000e+00> : vector<128x32xf32>
    %2 = tpu.matmul %0, %1, %cst {dimension_numbers = #tpu.dot_dimension_numbers<[1], [0], [0], [1], [0, 0, 1, 1], [], []>} : vector<128x16xf32>, vector<16x32xf32>, vector<128x32xf32> -> vector<128x32xf32>
    %c0_3 = arith.constant 0 : index
    %c0_4 = arith.constant 0 : index
    %3 = vector.load %arg2[%c0_3, %c0_4] : memref<128x4xf32, #tpu.memory_space<vmem>>, vector<128x4xf32>
    %c0_5 = arith.constant 0 : index
    %c0_6 = arith.constant 0 : index
    %4 = vector.load %arg4[%c0_5, %c0_6] : memref<4x32xf32, #tpu.memory_space<vmem>>, vector<4x32xf32>
    %cst_7 = arith.constant dense<0.000000e+00> : vector<128x32xf32>
    %5 = tpu.matmul %3, %4, %cst_7 {dimension_numbers = #tpu.dot_dimension_numbers<[1], [0], [0], [1], [0, 0, 1, 1], [], []>} : vector<128x4xf32>, vector<4x32xf32>, vector<128x32xf32> -> vector<128x32xf32>
    %6 = arith.addf %2, %5 : vector<128x32xf32>
    %c0_8 = arith.constant 0 : index
    %c0_9 = arith.constant 0 : index
    %7 = vector.load %arg5[%c0_8, %c0_9] : memref<1x32xf32, #tpu.memory_space<vmem>>, vector<1x32xf32>
    %8 = vector.broadcast %7 : vector<1x32xf32> to vector<128x32xf32>
    %9 = arith.addf %6, %8 : vector<128x32xf32>
    %cst_10 = arith.constant 0.000000e+00 : f32
    %10 = vector.broadcast %cst_10 : f32 to vector<128x32xf32>
    %11 = arith.maximumf %9, %10 : vector<128x32xf32>
    %c0_11 = arith.constant 0 : index
    %c0_12 = arith.constant 0 : index
    %12 = vector.load %arg6[%c0_11, %c0_12] : memref<32x32xf32, #tpu.memory_space<vmem>>, vector<32x32xf32>
    %cst_13 = arith.constant dense<0.000000e+00> : vector<128x32xf32>
    %13 = tpu.matmul %11, %12, %cst_13 {dimension_numbers = #tpu.dot_dimension_numbers<[1], [0], [0], [1], [0, 0, 1, 1], [], []>} : vector<128x32xf32>, vector<32x32xf32>, vector<128x32xf32> -> vector<128x32xf32>
    %c0_14 = arith.constant 0 : index
    %c0_15 = arith.constant 0 : index
    %14 = vector.load %arg7[%c0_14, %c0_15] : memref<1x32xf32, #tpu.memory_space<vmem>>, vector<1x32xf32>
    %15 = vector.broadcast %14 : vector<1x32xf32> to vector<128x32xf32>
    %16 = arith.addf %13, %15 : vector<128x32xf32>
    %cst_16 = arith.constant 0.000000e+00 : f32
    %17 = vector.broadcast %cst_16 : f32 to vector<128x32xf32>
    %18 = arith.maximumf %16, %17 : vector<128x32xf32>
    %c0_17 = arith.constant 0 : index
    %c0_18 = arith.constant 0 : index
    %19 = vector.load %arg8[%c0_17, %c0_18] : memref<1x32xf32, #tpu.memory_space<vmem>>, vector<1x32xf32>
    %20 = tpu.transpose %18, [1, 0] : vector<128x32xf32> -> vector<32x128xf32>
    %cst_19 = arith.constant dense<0.000000e+00> : vector<1x128xf32>
    %21 = tpu.matmul %19, %20, %cst_19 {dimension_numbers = #tpu.dot_dimension_numbers<[1], [0], [0], [1], [0, 0, 1, 1], [], []>} : vector<1x32xf32>, vector<32x128xf32>, vector<1x128xf32> -> vector<1x128xf32>
    %c0_20 = arith.constant 0 : index
    %c0_21 = arith.constant 0 : index
    %22 = vector.load %arg9[%c0_20, %c0_21] : memref<1x1xf32, #tpu.memory_space<vmem>>, vector<1x1xf32>
    %23 = vector.broadcast %22 : vector<1x1xf32> to vector<1x128xf32>
    %24 = arith.addf %21, %23 : vector<1x128xf32>
    %c0_22 = arith.constant 0 : index
    %c0_23 = arith.constant 0 : index
    %25 = vector.load %arg10[%c0_22, %c0_23] : memref<1x128xf32, #tpu.memory_space<vmem>>, vector<1x128xf32>
    tpu.vector_store %arg10[%c0_22, %c0_23], %24 {strides = array<i32>} : memref<1x128xf32, #tpu.memory_space<vmem>>, vector<1x128xf32>,
    return
  }
  func.func @transform_0(%arg0: i32) -> (i32, i32) {
    %c0_i32 = arith.constant 0 : i32
    %c0_i32_0 = arith.constant 0 : i32
    return %arg0, %c0_i32 : i32, i32
  }
  func.func @transform_1(%arg0: i32) -> (i32, i32) {
    %c0_i32 = arith.constant 0 : i32
    %c0_i32_0 = arith.constant 0 : i32
    return %arg0, %c0_i32 : i32, i32
  }
  func.func @transform_2(%arg0: i32) -> (i32, i32) {
    %c0_i32 = arith.constant 0 : i32
    %c0_i32_0 = arith.constant 0 : i32
    %c0_i32_1 = arith.constant 0 : i32
    return %c0_i32, %c0_i32_0 : i32, i32
  }
  func.func @transform_3(%arg0: i32) -> (i32, i32) {
    %c0_i32 = arith.constant 0 : i32
    %c0_i32_0 = arith.constant 0 : i32
    %c0_i32_1 = arith.constant 0 : i32
    return %c0_i32, %c0_i32_0 : i32, i32
  }
  func.func @transform_4(%arg0: i32) -> (i32, i32) {
    %c0_i32 = arith.constant 0 : i32
    %c0_i32_0 = arith.constant 0 : i32
    %c0_i32_1 = arith.constant 0 : i32
    return %c0_i32, %c0_i32_0 : i32, i32
  }
  func.func @transform_5(%arg0: i32) -> (i32, i32) {
    %c0_i32 = arith.constant 0 : i32
    %c0_i32_0 = arith.constant 0 : i32
    %c0_i32_1 = arith.constant 0 : i32
    return %c0_i32, %c0_i32_0 : i32, i32
  }
  func.func @transform_6(%arg0: i32) -> (i32, i32) {
    %c0_i32 = arith.constant 0 : i32
    %c0_i32_0 = arith.constant 0 : i32
    %c0_i32_1 = arith.constant 0 : i32
    return %c0_i32, %c0_i32_0 : i32, i32
  }
  func.func @transform_7(%arg0: i32) -> (i32, i32) {
    %c0_i32 = arith.constant 0 : i32
    %c0_i32_0 = arith.constant 0 : i32
    %c0_i32_1 = arith.constant 0 : i32
    return %c0_i32, %c0_i32_0 : i32, i32
  }
  func.func @transform_8(%arg0: i32) -> (i32, i32) {
    %c0_i32 = arith.constant 0 : i32
    %c0_i32_0 = arith.constant 0 : i32
    %c0_i32_1 = arith.constant 0 : i32
    return %c0_i32, %c0_i32_0 : i32, i32
  }
  func.func @transform_9(%arg0: i32) -> (i32, i32) {
    %c0_i32 = arith.constant 0 : i32
    %c0_i32_0 = arith.constant 0 : i32
    return %c0_i32, %arg0 : i32, i32
  }
}

</mosaic_0001>

<bundles_post_ra>
// kernel: tpu_custom_call.1
= control target key start
LH: loop header
LB: loop body
LE: loop exit
PB: predicated region body
PF: predicated region fallthrough
CT: control target
= control target key end

     0   :  { %s2048_s0 = inlined_call_operand.vmem [shape: f32[200,16], index: 0, kind: input, shape index: {}]   ;;  %s2049_s1 = inlined_call_operand.vmem [shape: f32[200,4], index: 1, kind: input, shape index: {}]   ;;  %s2050_s2 = inlined_call_operand.vmem [shape: f32[16,32], index: 2, kind: input, shape index: {}]   ;;  %s2051_s3 = inlined_call_operand.vmem [shape: f32[4,32], index: 3, kind: input, shape index: {}]   ;;  %s2052_s4 = inlined_call_operand.vmem [shape: f32[1,32], index: 4, kind: input, shape index: {}]   ;;  %s2053_s5 = inlined_call_operand.vmem [shape: f32[32,32], index: 5, kind: input, shape index: {}]   ;;  %s2054_s6 = inlined_call_operand.vmem [shape: f32[1,32], index: 6, kind: input, shape index: {}]   ;;  %s2055_s7 = inlined_call_operand.vmem [shape: f32[1,32], index: 7, kind: input, shape index: {}]   ;;  %s2056_s8 = inlined_call_operand.<no memory space> [shape: f32[1,1], index: 8, kind: input, shape index: {}]   ;;  %s2057_s9 = inlined_call_operand.hbm [shape: f32[1,256], index: 9, kind: output, shape index: {}]  }
   0x1   :  { %v14_v0 = vstv %s2056_s8 }
   0x2   :  { %15 = vst [vmem:[#allocation2] sm:$0x1] %v14_v0 }
   0x3   :  { %16 = vsyncpa [#allocation4], 0 }
   0x4   :  { %18 = vsyncpa [#allocation4 + $0x1], 0  ;;  %s1794_s11 = smov 0   ;;  %s1796_s12 = smov 0  }
   0x5   :  { %s1798_s13 = smov 0   ;;  %s1800_s14 = smov 0  }
   0x6 LB: > { %s1295_s8 = sadd.s32 4294967295, %s1734_s14   ;;  %s1296_s15 = sadd.s32 4294967294, %s1734_s14   ;;  %s1734_s14 = sphi %s1800_s14, %s2065_s14   ;;  %s1730_s13 = sphi %s1798_s13, %s2064_s13   ;;  %s1726_s12 = sphi %s1796_s12, %s2063_s12   ;;  %s1722_s11 = sphi %s1794_s11, %s2062_s11  }
   0x7   : > { %s1817_s16 = sadd.s32 1, %s1734_s14   ;;  %s230_s17 = sadd.s32 1, %s1730_s13 }
   0x8   : > { %s227_s18 = ssub.s32 %s1734_s14, %s1817_s16  ;;  %p240_p0 = scmp.ne.s32.totalorder %s1730_s13, %s1726_s12 }
   0x9   : > { %p228_p1 = scmp.eq.s32.totalorder %s227_s18, 0  ;;  %p241_p2 = scmp.eq.s32.totalorder %s1295_s8, 1 }
   0xa   : > { %p246_p3 = scmp.ne.s32.totalorder %s1726_s12, %s1722_s11  ;;  %p247_p4 = scmp.eq.s32.totalorder %s1296_s15, 1 }
   0xb   : > { %s1827_s19 = scalar_select %p228_p1, %s1730_s13, %s230_s17  }
   0xc   : > { %p1829_p5 = por %p241_p2, %p240_p0  ;;  %p1833_p6 = por %p247_p4, %p246_p3 }
   0xd   : > { %p1299_p7 = scmp.ge.s32.totalorder %s1734_s14, 1  ;;  %p320_p8 = scmp.lt.s32.totalorder %s1734_s14, 3 }
   0xf   : > { %p321_p9 = pnand %p1299_p7, %p320_p8 }
  0x10   : > { %v430_v1 = vld [vmem:[%s2051_s3] sm:$0xf] (!%p321_p9)  ;;  %vm480_vm0 = vcmask (!%p321_p9), 1043456   ;;  %s1842_s24 = sshll.u32 (!%p321_p9), %s1295_s8, 4  ;;  %v413_v3 = vld [vmem:[%s2050_s2 + $0x8] sm:$0xff] (!%p321_p9)  ;;  %vm431_vm1 = vcmask (!%p321_p9), 31744  }
  0x11   : > { %324 = sbr.rel (%p321_p9) target bundleno = 790 (0x316), region = 56  ;;  %v412_v2 = vld [vmem:[%s2050_s2] sm:$0xff] (!%p321_p9)  ;;  %1447 = vmatprep.subr.msk.mxu0 (!%p321_p9), %vm480_vm0, %v430_v1  ;;  %p373_p10 = scmp.lt.s32.totalorder (!%p321_p9), %s1842_s24, 24  ;;  %v863_v5 = vld [vmem:[%s2053_s5 + $0x8] sm:$0xff] (!%p321_p9)  ;;  %vm629_vm2 = vcmask (!%p321_p9), 130048   ;;  %v864_v40 = vld [vmem:[%s2053_s5 + $0x10] sm:$0xff] (!%p321_p9) }
  0x12   : > { %v862_v4 = vld [vmem:[%s2053_s5] sm:$0xff] (!%p321_p9)  ;;  %1448 = vmatpush3.msk.msra.mxu0 (!%p321_p9), %vm480_vm0, %v430_v1  ;;  %v1568_v6 = vpack.c.bf16 (!%p321_p9), %v413_v3, %v412_v2  ;;  %v865_v41 = vld [vmem:[%s2053_s5 + $0x18] sm:$0xff] (!%p321_p9)  ;;  %vm873_vm3 = vcmask (!%p321_p9), 261120   ;;  %vm1737_vm4 = vmmov (!%p321_p9), 0   ;;  %s366_s25 = sand.u32 (!%p321_p9), 1, %s1726_s12   ;;  %s2006_s30 = scalar_lea.hbm (!%p321_p9), %s2057_s9, %s1842_s24 }
  0x13   : > { %v1572_v7 = vpack.c.bf16 (!%p321_p9), %v863_v5, %v862_v4  ;;  %v1576_v42 = vpack.c.bf16 (!%p321_p9), %v865_v41, %v864_v40  ;;  %v1337_v43 = vld [vmem:[%s2052_s4] ss:$0 sm:$0xff] (!%p321_p9)  ;;  %vm1970_vm5 = vmpackc.low (!%p321_p9), %vm873_vm3, %vm873_vm3  ;;  %s367_s26 = scalar_lea.vmem (!%p321_p9), [#allocation3], %s366_s25  ;;  %s1217_s10 = scalar_lea.sflag (!%p321_p9), [#allocation4], %s366_s25 }
  0x14   : > { %1569 = vmatprep.subr.bf16.mxu0 (!%p321_p9), %v1568_v6 }
  0x15   : > { %1573 = vmatprep.subr.bf16.mxu1 (!%p321_p9), %v1572_v7 }
  0x16   : > { %1575 = vmatpush3.bf16.msra.mxu1 (!%p321_p9), %v1572_v7 }
  0x17   : > { %1577 = vmatprep.subr.bf16.mxu1 (!%p321_p9), %v1576_v42 }
  0x18   : > { %s1858_s8 = scalar_select %p373_p10, %s1842_s24, 24 }
  0x1a   : > { %s1301_s17 = sshll.u32 %s1858_s8, 3  ;;  %1579 = vmatpush3.bf16.msra.mxu1 %v1576_v42  ;;  %s1740_s8 = smov [#allocation3]  }
  0x1b   : > { %s1866_s23 = scalar_lea.vmem %s2049_s1, %s1301_s17  ;;  %s1901_s27 = scalar_lea.vmem %s2048_s0, %s1301_s17 }
  0x1c   : > { %v414_v8 = vld [vmem:[%s1866_s23] sm:$0xff]  ;;  %v415_v9 = vld [vmem:[%s1866_s23 + $0x8] sm:$0xff]  ;;  %v416_v10 = vld [vmem:[%s1866_s23 + $0x10] sm:$0xff]  ;;  %s1676_s17 = sshll.u32 %s1740_s8, 4  ;;  %s1677_s17 = int_to_ptr.vmem [resolvable:$false] %s1676_s17 }
  0x1d   : > { %1449 = vmatprep.mubr.msk.f32.mxu0 %vm431_vm1, %v414_v8  ;;  %v417_v11 = vld [vmem:[%s1866_s23 + $0x18] sm:$0xff]  ;;  %v418_v12 = vld [vmem:[%s1866_s23 + $0x20] sm:$0xff]  ;;  %v419_v13 = vld [vmem:[%s1866_s23 + $0x28] sm:$0xff]  ;;  %s1678_s18 = scalar_lea.vmem %s1677_s17, 32 }
  0x1e   : > { %1450 = vmatmul.mubr.msk.f32.vlgmr.msra.gmra.mrb[0].mxu0 %vm431_vm1, %v415_v9  ;;  %v420_v14 = vld [vmem:[%s1866_s23 + $0x30] sm:$0xff]  ;;  %v421_v15 = vld [vmem:[%s1866_s23 + $0x38] sm:$0xff]  ;;  %v422_v16 = vld [vmem:[%s1866_s23 + $0x40] sm:$0xff] }
  0x1f   : > { %1571 = vmatpush3.bf16.msra.mxu0 %v1568_v6  ;;  %1452 = vmatprep.mubr.msk.f32.mxu0 %vm431_vm1, %v416_v10  ;;  %v423_v17 = vld [vmem:[%s1866_s23 + $0x48] sm:$0xff]  ;;  %v424_v18 = vld [vmem:[%s1866_s23 + $0x50] sm:$0xff]  ;;  %v425_v19 = vld [vmem:[%s1866_s23 + $0x58] sm:$0xff] }
  0x20   : > { %v426_v20 = vld [vmem:[%s1866_s23 + $0x60] sm:$0xff]  ;;  %v427_v21 = vld [vmem:[%s1866_s23 + $0x68] sm:$0xff]  ;;  %v428_v22 = vld [vmem:[%s1866_s23 + $0x70] sm:$0xff] }
  0x21   : > { %v429_v23 = vld [vmem:[%s1866_s23 + $0x78] sm:$0xff]  ;;  %v396_v24 = vld [vmem:[%s1901_s27] sm:$0xff]  ;;  %v397_v25 = vld [vmem:[%s1901_s27 + $0x8] sm:$0xff] }
  0x22   : > { %1453 = vmatmul.mubr.msk.f32.gmra.mrb[2].mxu0 %vm431_vm1, %v417_v11  ;;  %v398_v26 = vld [vmem:[%s1901_s27 + $0x10] sm:$0xff]  ;;  %v399_v27 = vld [vmem:[%s1901_s27 + $0x18] sm:$0xff]  ;;  %v400_v28 = vld [vmem:[%s1901_s27 + $0x20] sm:$0xff] }
  0x23   : > { %1455 = vmatprep.mubr.msk.f32.mxu0 %vm431_vm1, %v418_v12  ;;  %v401_v29 = vld [vmem:[%s1901_s27 + $0x28] sm:$0xff]  ;;  %v402_v30 = vld [vmem:[%s1901_s27 + $0x30] sm:$0xff]  ;;  %v403_v31 = vld [vmem:[%s1901_s27 + $0x38] sm:$0xff] }
  0x24   : > { %v404_v32 = vld [vmem:[%s1901_s27 + $0x40] sm:$0xff]  ;;  %v405_v33 = vld [vmem:[%s1901_s27 + $0x48] sm:$0xff]  ;;  %v406_v34 = vld [vmem:[%s1901_s27 + $0x50] sm:$0xff] }
  0x25   : > { %v407_v35 = vld [vmem:[%s1901_s27 + $0x58] sm:$0xff]  ;;  %v408_v36 = vld [vmem:[%s1901_s27 + $0x60] sm:$0xff]  ;;  %v409_v37 = vld [vmem:[%s1901_s27 + $0x68] sm:$0xff] }
  0x26   : > { %1456 = vmatmul.mubr.msk.f32.gmra.mrb[4].mxu0 %vm431_vm1, %v419_v13  ;;  %v410_v38 = vld [vmem:[%s1901_s27 + $0x70] sm:$0xff]  ;;  %v411_v39 = vld [vmem:[%s1901_s27 + $0x78] sm:$0xff]  ;;  %s1229_s27 = sshll.u32 %s367_s26, 4  ;;  %s2008_s27 = int_to_ptr.vmem [resolvable:$true] %s1229_s27 }
  0x27   : > { %1458 = vmatprep.mubr.msk.f32.mxu0 %vm431_vm1, %v420_v14  ;;  %s1672_s15 = scalar_lea.vmem %s2008_s27, 16  ;;  %p1679_p0 = scmp.lt.s32.totalorder %s2008_s27, %s1677_s17 }
  0x28   : > { %p1673_p11 = scmp.ne.s32.totalorder %s2008_s27, %s1672_s15  ;;  %p1680_p1 = scmp.lt.s32.totalorder %s1678_s18, %s1672_s15 }
  0x2a   : > { %1459 = vmatmul.mubr.msk.f32.gmra.mrb[6].mxu0 %vm431_vm1, %v421_v15  ;;  %p1674_p12 = pnand %p1673_p11, %p1829_p5  ;;  %p1681_p2 = por %p1680_p1, %p1679_p0 }
  0x2b   : > { %1461 = vmatprep.mubr.msk.f32.mxu0 %vm431_vm1, %v422_v16 }
  0x2c   : > { %p1675_p13 = pneg %p1674_p12 }
  0x2e   : > { %1462 = vmatmul.mubr.msk.f32.gmra.mrb[8].mxu0 %vm431_vm1, %v423_v17  ;;  %p1682_p3 = pnand %p1681_p2, %p1675_p13 }
  0x2f   : > { %1464 = vmatprep.mubr.msk.f32.mxu0 %vm431_vm1, %v424_v18 }
  0x32   : > { %1465 = vmatmul.mubr.msk.f32.gmra.mrb[10].mxu0 %vm431_vm1, %v425_v19 }
  0x33   : > { %1467 = vmatprep.mubr.msk.f32.mxu0 %vm431_vm1, %v426_v20 }
  0x36   : > { %1468 = vmatmul.mubr.msk.f32.gmra.mrb[12].mxu0 %vm431_vm1, %v427_v21 }
  0x37   : > { %1470 = vmatprep.mubr.msk.f32.mxu0 %vm431_vm1, %v428_v22 }
  0x3a   : > { %1471 = vmatmul.mubr.msk.f32.gmra.mrb[14].mxu0 %vm431_vm1, %v429_v23 }
  0x3b   : > { %1477 = vmatprep.mubr.msk.f32.mxu0 %vm629_vm2, %v396_v24 }
  0x3e   : > { %1478 = vmatmul.mubr.msk.f32.vlgmr.msra.gmra.mrb[0].mxu0 %vm629_vm2, %v397_v25 }
  0x3f   : > { %1480 = vmatprep.mubr.msk.f32.mxu0 %vm629_vm2, %v398_v26 }
  0x42   : > { %1481 = vmatmul.mubr.msk.f32.gmra.mrb[2].mxu0 %vm629_vm2, %v399_v27 }
  0x43   : > { %1483 = vmatprep.mubr.msk.f32.mxu0 %vm629_vm2, %v400_v28  ;;  %v1736_v28 = vmov 0.0|0.0  }
  0x44   : > { %1580 = vmatprep.subr.bf16.mxu1 %v1736_v28 }
  0x46   : > { %1484 = vmatmul.mubr.msk.f32.gmra.mrb[4].mxu0 %vm629_vm2, %v401_v29  ;;  %v1738_v29 = vmov 0.0  }
  0x47   : > { %1486 = vmatprep.mubr.msk.f32.mxu0 %vm629_vm2, %v402_v30  ;;  %v1084_v30 = vld [vmem:[#allocation2] sm:$0x1] }
  0x4a   : > { %1487 = vmatmul.mubr.msk.f32.gmra.mrb[6].mxu0 %vm629_vm2, %v403_v31  ;;  %v1739_v31 = vmov 0  }
  0x4b   : > { %1489 = vmatprep.mubr.msk.f32.mxu0 %vm629_vm2, %v404_v32  ;;  %1671 = vset.pattern.permute.xlu0 %v1739_v31  ;;  %v1338_v32 = vld [vmem:[%s2054_s6] ss:$0 sm:$0xff] }
  0x4c   : > { %1087 = vperm.xlu0 %1671, %v1084_v30  }
  0x4e   : > { %1490 = vmatmul.mubr.msk.f32.gmra.mrb[8].mxu0 %vm629_vm2, %v405_v33 }
  0x4f   : > { %1492 = vmatprep.mubr.msk.f32.mxu0 %vm629_vm2, %v406_v34 }
  0x52   : > { %1493 = vmatmul.mubr.msk.f32.gmra.mrb[10].mxu0 %vm629_vm2, %v407_v35 }
  0x53   : > { %1495 = vmatprep.mubr.msk.f32.mxu0 %vm629_vm2, %v408_v36 }
  0x56   : > { %1496 = vmatmul.mubr.msk.f32.gmra.mrb[12].mxu0 %vm629_vm2, %v409_v37 }
  0x57   : > { %1498 = vmatprep.mubr.msk.f32.mxu0 %vm629_vm2, %v410_v38 }
  0x5a   : > { %1499 = vmatmul.mubr.msk.f32.gmra.mrb[14].mxu0 %vm629_vm2, %v411_v39 }
  0xcb   : > { %v1088_v31 = vpop.permute.xlu0 %1087 }
 0x111   : > { %v1479_v44 = vpop.f32.mrb[0].mxu0 }
 0x112   : > { %v831_v45 = vadd.f32 %v1479_v44, %v1337_v43  ;;  %v744_v46 = vpop.f32.mrb[1].mxu0 }
 0x113   : > { %v830_v47 = vadd.f32 %v1337_v43, %v744_v46 }
 0x114   : > { %v847_v50 = vmax.f32 %v831_v45, 0.0 }
 0x115   : > { %v846_v48 = vmax.f32 %v830_v47, 0.0  ;;  %v1482_v49 = vpop.f32.mrb[2].mxu0 }
 0x116   : > { %v833_v51 = vadd.f32 %v1482_v49, %v1337_v43  ;;  %v754_v52 = vpop.f32.mrb[3].mxu0 }
 0x117   : > { %v832_v53 = vadd.f32 %v1337_v43, %v754_v52  ;;  %1509 = vmatprep.mubr.msk.f32.mxu1 %vm873_vm3, %v846_v48 }
 0x118   : > { %1510 = vmatmul.mubr.msk.f32.vlgmr.msra.gmra.mrb[0].mxu1 %vm873_vm3, %v847_v50  ;;  %v849_v56 = vmax.f32 %v833_v51, 0.0 }
 0x119   : > { %v848_v54 = vmax.f32 %v832_v53, 0.0  ;;  %v1485_v55 = vpop.f32.mrb[4].mxu0 }
 0x11a   : > { %v835_v57 = vadd.f32 %v1485_v55, %v1337_v43  ;;  %v764_v58 = vpop.f32.mrb[5].mxu0 }
 0x11b   : > { %v834_v59 = vadd.f32 %v1337_v43, %v764_v58  ;;  %1512 = vmatprep.mubr.msk.f32.mxu1 %vm873_vm3, %v848_v54 }
 0x11c   : > { %1513 = vmatmul.mubr.msk.f32.gmra.mrb[2].mxu1 %vm873_vm3, %v849_v56  ;;  %v851_v62 = vmax.f32 %v835_v57, 0.0 }
 0x11d   : > { %v850_v60 = vmax.f32 %v834_v59, 0.0  ;;  %v1488_v61 = vpop.f32.mrb[6].mxu0 }
 0x11e   : > { %v837_v63 = vadd.f32 %v1488_v61, %v1337_v43  ;;  %v774_v0 = vpop.f32.mrb[7].mxu0 }
 0x11f   : > { %v836_v1 = vadd.f32 %v1337_v43, %v774_v0  ;;  %1515 = vmatprep.mubr.msk.f32.mxu1 %vm873_vm3, %v850_v60 }
 0x120   : > { %1516 = vmatmul.mubr.msk.f32.gmra.mrb[4].mxu1 %vm873_vm3, %v851_v62  ;;  %v853_v4 = vmax.f32 %v837_v63, 0.0 }
 0x121   : > { %v852_v2 = vmax.f32 %v836_v1, 0.0  ;;  %v1491_v3 = vpop.f32.mrb[8].mxu0 }
 0x122   : > { %v839_v5 = vadd.f32 %v1491_v3, %v1337_v43  ;;  %v784_v6 = vpop.f32.mrb[9].mxu0 }
 0x123   : > { %v838_v7 = vadd.f32 %v1337_v43, %v784_v6  ;;  %1518 = vmatprep.mubr.msk.f32.mxu1 %vm873_vm3, %v852_v2 }
 0x124   : > { %1519 = vmatmul.mubr.msk.f32.gmra.mrb[6].mxu1 %vm873_vm3, %v853_v4  ;;  %v855_v10 = vmax.f32 %v839_v5, 0.0 }
 0x125   : > { %v854_v8 = vmax.f32 %v838_v7, 0.0  ;;  %v1494_v9 = vpop.f32.mrb[10].mxu0 }
 0x126   : > { %v841_v11 = vadd.f32 %v1494_v9, %v1337_v43  ;;  %v794_v12 = vpop.f32.mrb[11].mxu0 }
 0x127   : > { %v840_v13 = vadd.f32 %v1337_v43, %v794_v12  ;;  %1521 = vmatprep.mubr.msk.f32.mxu1 %vm873_vm3, %v854_v8 }
 0x128   : > { %1522 = vmatmul.mubr.msk.f32.gmra.mrb[8].mxu1 %vm873_vm3, %v855_v10  ;;  %v857_v16 = vmax.f32 %v841_v11, 0.0 }
 0x129   : > { %v856_v14 = vmax.f32 %v840_v13, 0.0  ;;  %v1497_v15 = vpop.f32.mrb[12].mxu0 }
 0x12a   : > { %v843_v17 = vadd.f32 %v1497_v15, %v1337_v43  ;;  %v804_v18 = vpop.f32.mrb[13].mxu0 }
 0x12b   : > { %v842_v19 = vadd.f32 %v1337_v43, %v804_v18  ;;  %1524 = vmatprep.mubr.msk.f32.mxu1 %vm873_vm3, %v856_v14 }
 0x12c   : > { %1525 = vmatmul.mubr.msk.f32.gmra.mrb[10].mxu1 %vm873_vm3, %v857_v16  ;;  %v859_v22 = vmax.f32 %v843_v17, 0.0 }
 0x12d   : > { %v858_v20 = vmax.f32 %v842_v19, 0.0  ;;  %v1500_v21 = vpop.f32.mrb[14].mxu0 }
 0x12e   : > { %v845_v23 = vadd.f32 %v1500_v21, %v1337_v43  ;;  %v814_v24 = vpop.f32.mrb[15].mxu0 }
 0x12f   : > { %v844_v25 = vadd.f32 %v1337_v43, %v814_v24  ;;  %1527 = vmatprep.mubr.msk.f32.mxu1 %vm873_vm3, %v858_v20 }
 0x130   : > { %1528 = vmatmul.mubr.msk.f32.gmra.mrb[12].mxu1 %vm873_vm3, %v859_v22  ;;  %v861_v27 = vmax.f32 %v845_v23, 0.0 }
 0x131   : > { %v860_v26 = vmax.f32 %v844_v25, 0.0 }
 0x133   : > { %1530 = vmatprep.mubr.msk.f32.mxu1 %vm873_vm3, %v860_v26  ;;  %v1083_v26 = vld [vmem:[%s2055_s7] sm:$0x1] }
 0x134   : > { %1531 = vmatmul.mubr.msk.f32.gmra.mrb[14].mxu1 %vm873_vm3, %v861_v27  ;;  %v1090_v27 = vlaneseq }
 0x135   : > { %1565 = vmatprep.mubr.msk.f32.mxu1 %vm1737_vm4, %v1738_v29 }
 0x136   : > { %v1091_v29 = vshrl.u32 %v1090_v27, 7 }
 0x138   : > { %v1092_v30 = vsub.s32 0, %v1091_v29 }
 0x1eb   : > { %v1511_v33 = vpop.f32.mrb[0].mxu1 }
 0x1ec   : > { %v994_v34 = vadd.f32 %v1511_v33, %v1338_v32  ;;  %v988_v35 = vpop.f32.mrb[1].mxu1 }
 0x1ed   : > { %v989_v36 = vadd.f32 %v1338_v32, %v988_v35 }
 0x1ee   : > { %v1068_v37 = vmax.f32 %v994_v34, 0.0 }
 0x1ef   : > { %v1067_v38 = vmax.f32 %v989_v36, 0.0  ;;  %v1514_v39 = vpop.f32.mrb[2].mxu1 }
 0x1f0   : > { %v1004_v40 = vadd.f32 %v1514_v39, %v1338_v32  ;;  %v998_v41 = vpop.f32.mrb[3].mxu1 }
 0x1f1   : > { %v1581_v43 = vpack.c.bf16 %v1068_v37, %v1067_v38  ;;  %v999_v44 = vadd.f32 %v1338_v32, %v998_v41 }
 0x1f2   : > { %v1070_v45 = vmax.f32 %v1004_v40, 0.0 }
 0x1f3   : > { %v1069_v46 = vmax.f32 %v999_v44, 0.0  ;;  %v1517_v47 = vpop.f32.mrb[4].mxu1  ;;  %1583 = vmatpush3.bf16.xpose.msk.msra.mxu1 %vm1970_vm5, %v1581_v43 }
 0x1f4   : > { %v1014_v48 = vadd.f32 %v1517_v47, %v1338_v32  ;;  %v1008_v49 = vpop.f32.mrb[5].mxu1  ;;  %1584 = vmatprep.subr.bf16.mxu1 %v1736_v28 }
 0x1f5   : > { %v1585_v50 = vpack.c.bf16 %v1070_v45, %v1069_v46  ;;  %v1009_v51 = vadd.f32 %v1338_v32, %v1008_v49 }
 0x1f6   : > { %v1072_v52 = vmax.f32 %v1014_v48, 0.0 }
 0x1f7   : > { %v1071_v53 = vmax.f32 %v1009_v51, 0.0  ;;  %v1520_v54 = vpop.f32.mrb[6].mxu1 }
 0x1f8   : > { %v1024_v55 = vadd.f32 %v1520_v54, %v1338_v32  ;;  %v1018_v56 = vpop.f32.mrb[7].mxu1 }
 0x1f9   : > { %v1589_v57 = vpack.c.bf16 %v1072_v52, %v1071_v53  ;;  %v1019_v58 = vadd.f32 %v1338_v32, %v1018_v56 }
 0x1fa   : > { %v1074_v59 = vmax.f32 %v1024_v55, 0.0 }
 0x1fb   : > { %v1073_v60 = vmax.f32 %v1019_v58, 0.0  ;;  %v1523_v61 = vpop.f32.mrb[8].mxu1  ;;  %1587 = vmatpush3.bf16.xpose.msk.msra.mxu1 %vm1970_vm5, %v1585_v50 }
 0x1fc   : > { %v1034_v62 = vadd.f32 %v1523_v61, %v1338_v32  ;;  %v1028_v63 = vpop.f32.mrb[9].mxu1  ;;  %1588 = vmatprep.subr.bf16.mxu1 %v1736_v28 }
 0x1fd   : > { %v1593_v0 = vpack.c.bf16 %v1074_v59, %v1073_v60  ;;  %v1029_v1 = vadd.f32 %v1338_v32, %v1028_v63 }
 0x1fe   : > { %v1076_v2 = vmax.f32 %v1034_v62, 0.0 }
 0x1ff   : > { %v1075_v3 = vmax.f32 %v1029_v1, 0.0  ;;  %v1526_v4 = vpop.f32.mrb[10].mxu1 }
 0x200   : > { %v1044_v5 = vadd.f32 %v1526_v4, %v1338_v32  ;;  %v1038_v6 = vpop.f32.mrb[11].mxu1 }
 0x201   : > { %v1597_v7 = vpack.c.bf16 %v1076_v2, %v1075_v3  ;;  %v1039_v8 = vadd.f32 %v1338_v32, %v1038_v6 }
 0x202   : > { %v1078_v9 = vmax.f32 %v1044_v5, 0.0 }
 0x203   : > { %v1077_v10 = vmax.f32 %v1039_v8, 0.0  ;;  %v1529_v11 = vpop.f32.mrb[12].mxu1  ;;  %1591 = vmatpush3.bf16.xpose.msk.msra.mxu1 %vm1970_vm5, %v1589_v57 }
 0x204   : > { %v1054_v12 = vadd.f32 %v1529_v11, %v1338_v32  ;;  %v1048_v13 = vpop.f32.mrb[13].mxu1  ;;  %1592 = vmatprep.subr.bf16.mxu1 %v1736_v28 }
 0x205   : > { %v1601_v14 = vpack.c.bf16 %v1078_v9, %v1077_v10  ;;  %v1049_v15 = vadd.f32 %v1338_v32, %v1048_v13 }
 0x206   : > { %v1080_v16 = vmax.f32 %v1054_v12, 0.0 }
 0x207   : > { %v1079_v17 = vmax.f32 %v1049_v15, 0.0  ;;  %v1532_v18 = vpop.f32.mrb[14].mxu1 }
 0x208   : > { %v1064_v19 = vadd.f32 %v1532_v18, %v1338_v32  ;;  %v1058_v20 = vpop.f32.mrb[15].mxu1 }
 0x209   : > { %v1605_v21 = vpack.c.bf16 %v1080_v16, %v1079_v17  ;;  %v1059_v22 = vadd.f32 %v1338_v32, %v1058_v20  ;;  %v1093_v32 = vrot.slane %v1088_v31, %v1092_v30 }
 0x20a   : > { %v1082_v23 = vmax.f32 %v1064_v19, 0.0 }
 0x20b   : > { %v1081_v24 = vmax.f32 %v1059_v22, 0.0  ;;  %1595 = vmatpush3.bf16.xpose.msk.msra.mxu1 %vm1970_vm5, %v1593_v0 }
 0x20c   : > { %1596 = vmatprep.subr.bf16.mxu1 %v1736_v28 }
 0x20d   : > { %v1609_v25 = vpack.c.bf16 %v1082_v23, %v1081_v24 }
 0x213   : > { %1599 = vmatpush3.bf16.xpose.msk.msra.mxu1 %vm1970_vm5, %v1597_v7 }
 0x214   : > { %1600 = vmatprep.subr.bf16.mxu1 %v1736_v28 }
 0x21b   : > { %1603 = vmatpush3.bf16.xpose.msk.msra.mxu1 %vm1970_vm5, %v1601_v14 }
 0x21c   : > { %1604 = vmatprep.subr.bf16.mxu1 %v1736_v28 }
 0x223   : > { %1607 = vmatpush3.bf16.xpose.msk.msra.mxu1 %vm1970_vm5, %v1605_v21 }
 0x224   : > { %1608 = vmatprep.subr.bf16.mxu1 %v1736_v28 }
 0x22b   : > { %1611 = vmatpush3.bf16.xpose.msk.msra.mxu1 %vm1970_vm5, %v1609_v25 }
 0x232   : > { %1566 = vmatmul.mubr.msk.f32.vlgmr.msra.gmra.mrb[16].mxu1 %vm873_vm3, %v1083_v26 }
 0x305   : > { %v1211_v33 = vpop.f32.mrb[16].mxu1 }
 0x306   : > { %v1212_v28 = vadd.f32 %v1211_v33, %v1093_v32  ;;  %v1567_v34 = vpop.f32.mrb[17].mxu1 }
 0x308   : > { %1215 = vst [vmem:[%s367_s26] sm:$0x1] %v1212_v28 }
 0x309   : > { %1685 = shalt.err (!%p1682_p3)
}
 0x30a   : > { %s1686_s24 = scalar_lea.hbm %s2006_s30, 16  ;;  %s1690_s25 = scalar_lea.hbm %s2057_s9, 32 }
 0x30b   : > { %p1687_p4 = scmp.ne.s32.totalorder %s2006_s30, %s1686_s24  ;;  %p1691_p9 = scmp.lt.u32.totalorder %s2006_s30, %s2057_s9 }
 0x30c   : > { %p1692_p10 = scmp.lt.u32.totalorder %s1690_s25, %s1686_s24  ;;  %p1694_p12 = scmp.lt.u32.totalorder %s1686_s24, %s2006_s30 }
 0x30d   : > { %p1688_p7 = pnand %p1687_p4, %p1829_p5 }
 0x30e   : > { %p1693_p11 = por %p1692_p10, %p1691_p9 }
 0x30f   : > { %p1689_p8 = pneg %p1688_p7 }
 0x310   : > { %p1695_p13 = por %p1694_p12, %p1693_p11 }
 0x312   : > { %p1696_p0 = pnand %p1695_p13, %p1689_p8 }
 0x314   : > { %1699 = shalt.err (!%p1696_p0)
}
 0x315   : > { %1628 = dma.vmem_to_hbm [thread:$0]  (%p1829_p5), %s2008_s27, 16, %s2006_s30, %s1217_s10  }
 0x316 PF: > { %p1634_p1 = scmp.ge.s32.totalorder %s1734_s14, 2  ;;  %s1241_s29 = sand.u32 1, %s1722_s11  }
 0x317   : > { %s1242_s15 = scalar_lea.sflag [#allocation4], %s1241_s29 }
 0x318   : > { %p1631_p2 = pnand %p1634_p1, %p1833_p6 }
 0x31a   : > { %1717 = dma.done.wait (!%p1631_p2), %s1242_s15, 16  }
 0x31b   : > { %1719 = vsyncadd (!%p1631_p2), %s1242_s15, 4294967280  ;;  %p21_p3 = scmp.ge.s32.totalorder %s1817_s16, 4   ;;  %s2062_s11 = smov %s1726_s12 }
 0x31c   : > { %s2063_s12 = smov %s1730_s13  ;;  %s2064_s13 = smov %s1827_s19 }
 0x31d   : > { %s2065_s14 = smov %s1817_s16  ;;  %23 = sbr.rel (!%p21_p3) target bundleno = 6 (0x6), region = 94 }
 0x324   :  { %1246 = vsyncpa [#allocation4], 1 }
 0x325   :  { %1248 = vsyncpa [#allocation4 + $0x1], 1 }

</bundles_post_ra>
